<compile_context>
chip_gen: v5e
topology: v5e:2x2
jax: 0.10.0
libtpu: 0.0.40
codegen_flags: <defaults>
</compile_context>

<pallas_src>
import math

import jax
import jax.numpy as jnp
from jax.experimental import pallas as pl
from jax.experimental.pallas import tpu as pltpu


def _build_pe_table(d_model: int, max_len: int = 5000) -> jnp.ndarray:
    """Deterministic sinusoidal table, identical to the PyTorch __init__."""
    position = jnp.arange(0, max_len, dtype=jnp.float32)[:, None]              # (L, 1)
    div_term = jnp.exp(
        jnp.arange(0, d_model, 2, dtype=jnp.float32) * -(math.log(10000.0) / d_model)
    )                                                                           # (D/2,)
    sin_part = jnp.sin(position * div_term)                                     # (L, D/2)
    cos_part = jnp.cos(position * div_term)                                     # (L, D/2)
    # interleave: pe[:, 0::2] = sin, pe[:, 1::2] = cos
    pe = jnp.stack([sin_part, cos_part], axis=-1).reshape(max_len, d_model)     # (L, D)
    return pe


def _pe_add_rows_kernel(x_ref, pe_ref, o_ref):
    # x_ref / o_ref: (B, tS, D) block;  pe_ref: (B, 1, D) constant block
    # (single DMA, reused every grid step), broadcast along the seq axis.
    o_ref[...] = x_ref[...] + pe_ref[...]
    # TODO(synk): dropout omitted (eval-mode identity); training-mode dropout would use
    # pltpu.prng_seed + pltpu.stateful_bernoulli here.


def _pe_add_flat_kernel(x_ref, pe_ref, o_ref):
    # x_ref / o_ref: (B, CT) lane-dense tile of the flattened (B, S*D) tensor.
    # pe_ref:        (B, CT) pre-repeated positional rows (constant block -> one DMA).
    o_ref[...] = x_ref[...] + pe_ref[...]


def _choose_flat_tile_width(n: int, d: int, itemsize: int, batch: int,
                            target_block_bytes: int) -> int:
    """Column-tile width over the flattened seq*d_model axis (Path B).

    Must be a multiple of d (so the pe row repeats cleanly inside a tile) and of 128
    (lane-dense, unmasked stores), i.e. a multiple of lcm(d, 128) -- or simply the
    whole row when that is already smaller than one lcm unit.
    """
    unit = (d * 128) // math.gcd(d, 128)  # lcm(d, 128)
    if unit >= n:
        return n
    k = max(1, target_block_bytes // (itemsize * batch * unit))
    return min(n, k * unit)


def positional_encoding_forward(x: jnp.ndarray, pe: jnp.ndarray,
                                *, target_block_bytes: int = 2 * 1024 * 1024) -> jnp.ndarray:
    """x: (B, S, D); pe: (max_len, D). Returns out[b,s,d] = x[b,s,d] + pe[b,d]."""
    B, S, D = x.shape
    itemsize = jnp.dtype(x.dtype).itemsize
    # pe row per *batch* index (faithful to `pe[:, :x.size(1)]` after the permute).
    pe_b = pe[:B].astype(x.dtype)                                    # (B, D)

    if D % 128 == 0:
        # -------- Path A: natural 3-D blocks, lane axis = D (dense), sublane = tS ----
        max_rows = max(1, target_block_bytes // (itemsize * B * D))
        if max_rows >= S:
            ts = S
        else:
            ts = min(S, max(8, (max_rows // 8) * 8))                 # mult of 8 or == S
        n_tiles = pl.cdiv(S, ts)
        return pl.pallas_call(
            _pe_add_rows_kernel,
            out_shape=jax.ShapeDtypeStruct((B, S, D), x.dtype),
            grid=(n_tiles,),
            in_specs=[
                pl.BlockSpec((B, ts, D), lambda t: (0, t, 0)),
                pl.BlockSpec((B, 1, D), lambda t: (0, 0, 0)),        # constant block
            ],
            out_specs=pl.BlockSpec((B, ts, D), lambda t: (0, t, 0)),
            compiler_params=pltpu.CompilerParams(dimension_semantics=("parallel",)),
            # TODO(synk): if the caller can donate x, input_output_aliases={0: 0} would
            # drop the extra (B, S, D) HBM allocation; left off since donation is not
            # guaranteed at this call site.
        )(x, pe_b[:, None, :])

    # -------- Path B: flatten to (B, S*D) so the lane axis stays dense for small D ----
    N = S * D
    ct = _choose_flat_tile_width(N, D, itemsize, B, target_block_bytes)
    n_tiles = pl.cdiv(N, ct)

    x2 = x.reshape(B, N)
    # Repeat the per-batch pe row along the flattened axis to match exactly one column
    # tile; ct is a multiple of D, so the periodic pattern is tile-position invariant
    # (including the padded tail of a partial last tile). Constant block index below
    # -> loaded into VMEM once and reused for every grid step.
    pe_rep = jnp.tile(pe_b, (1, ct // D))                            # (B, ct)

    out2 = pl.pallas_call(
        _pe_add_flat_kernel,
        out_shape=jax.ShapeDtypeStruct((B, N), x.dtype),
        grid=(n_tiles,),
        in_specs=[
            pl.BlockSpec((B, ct), lambda t: (0, t)),
            pl.BlockSpec((B, ct), lambda t: (0, 0)),                 # constant block
        ],
        out_specs=pl.BlockSpec((B, ct), lambda t: (0, t)),
        compiler_params=pltpu.CompilerParams(dimension_semantics=("parallel",)),
    )(x2, pe_rep)
    return out2.reshape(B, S, D)


def positional_encoding_reference(x: jnp.ndarray, pe: jnp.ndarray) -> jnp.ndarray:
    """Pure-JAX reference mirroring the PyTorch forward (eval mode)."""
    xp = jnp.transpose(x, (1, 0, 2))                 # (S, B, D)
    xp = xp + pe[None, : xp.shape[1], :]             # pe[:, :B] broadcast
    return jnp.transpose(xp, (1, 0, 2))              # (B, S, D)


if __name__ == "__main__":
    max_len = 5000
    key = jax.random.PRNGKey(0)
    k1, k2, k3, k4 = jax.random.split(key, 4)

    # --- case 1: module-sized demo shape, small odd-width d_model (Path B, 1 tile) ---
    B, S, D = 2, 8, 32
    x = jax.random.normal(k1, (B, S, D), dtype=jnp.float32)
    pe = _build_pe_table(D, max_len)
    out = jax.block_until_ready(positional_encoding_forward(x, pe))
    ref = positional_encoding_reference(x, pe)
    assert out.shape == (B, S, D)
    assert jnp.allclose(out, ref, atol=1e-6, rtol=1e-6), "mismatch vs reference (case 1)"

    # --- case 2: force multiple flattened column tiles (Path B, pipelined grid) ---
    B2, S2, D2 = 2, 32, 96
    x2 = jax.random.normal(k2, (B2, S2, D2), dtype=jnp.float32)
    pe2 = _build_pe_table(D2, max_len)
    out2 = jax.block_until_ready(
        positional_encoding_forward(x2, pe2, target_block_bytes=8 * 1024)  # -> 4 tiles
    )
    ref2 = positional_encoding_reference(x2, pe2)
    assert jnp.allclose(out2, ref2, atol=1e-6, rtol=1e-6), "mismatch vs reference (case 2)"

    # --- case 3: lane-aligned d_model (Path A, single seq tile) ---
    B3, S3, D3 = 2, 16, 128
    x3 = jax.random.normal(k3, (B3, S3, D3), dtype=jnp.float32)
    pe3 = _build_pe_table(D3, max_len)
    out3 = jax.block_until_ready(positional_encoding_forward(x3, pe3))
    ref3 = positional_encoding_reference(x3, pe3)
    assert jnp.allclose(out3, ref3, atol=1e-6, rtol=1e-6), "mismatch vs reference (case 3)"

    # --- case 4: lane-aligned d_model with multiple seq tiles (Path A, pipelined) ---
    B4, S4, D4 = 2, 36, 128
    x4 = jax.random.normal(k4, (B4, S4, D4), dtype=jnp.float32)
    pe4 = _build_pe_table(D4, max_len)
    out4 = jax.block_until_ready(
        positional_encoding_forward(x4, pe4, target_block_bytes=8 * 1024)  # ts=8 -> 5 tiles
    )
    ref4 = positional_encoding_reference(x4, pe4)
    assert jnp.allclose(out4, ref4, atol=1e-6, rtol=1e-6), "mismatch vs reference (case 4)"

    print("KERNEL_OK")
</pallas_src>

<mosaic_0001>
module attributes {stable_mosaic.version = 11 : i64} {
  func.func @_pe_add_flat_kernel(%arg0: i32, %arg1: memref<2x256xf32, #tpu.memory_space<vmem>>, %arg2: memref<2x256xf32, #tpu.memory_space<vmem>>, %arg3: memref<2x256xf32, #tpu.memory_space<vmem>>) attributes {dimension_semantics = [#tpu.dimension_semantics<parallel>], iteration_bounds = array<i64: 1>, scalar_prefetch = 0 : i64, scratch_operands = 0 : i64, tpu.core_type = #tpu.core_type<tc>, window_params = [{transform_indices = @transform_0, window_bounds = array<i64: 2, 256>}, {pipeline_mode = #tpu.pipeline_mode<synchronous>, transform_indices = @transform_1, window_bounds = array<i64: 2, 256>}, {transform_indices = @transform_2, window_bounds = array<i64: 2, 256>}]} {
    %c0 = arith.constant 0 : index
    %c0_0 = arith.constant 0 : index
    %0 = vector.load %arg1[%c0, %c0_0] : memref<2x256xf32, #tpu.memory_space<vmem>>, vector<2x256xf32>
    %c0_1 = arith.constant 0 : index
    %c0_2 = arith.constant 0 : index
    %1 = vector.load %arg2[%c0_1, %c0_2] : memref<2x256xf32, #tpu.memory_space<vmem>>, vector<2x256xf32>
    %2 = arith.addf %0, %1 : vector<2x256xf32>
    %c0_3 = arith.constant 0 : index
    %c0_4 = arith.constant 0 : index
    %3 = vector.load %arg3[%c0_3, %c0_4] : memref<2x256xf32, #tpu.memory_space<vmem>>, vector<2x256xf32>
    tpu.vector_store %arg3[%c0_3, %c0_4], %2 {strides = array<i32>} : memref<2x256xf32, #tpu.memory_space<vmem>>, vector<2x256xf32>,
    return
  }
  func.func @transform_0(%arg0: i32) -> (i32, i32) {
    %c0_i32 = arith.constant 0 : i32
    %c0_i32_0 = arith.constant 0 : i32
    return %c0_i32, %arg0 : i32, i32
  }
  func.func @transform_1(%arg0: i32) -> (i32, i32) {
    %c0_i32 = arith.constant 0 : i32
    %c0_i32_0 = arith.constant 0 : i32
    %c0_i32_1 = arith.constant 0 : i32
    return %c0_i32, %c0_i32_0 : i32, i32
  }
  func.func @transform_2(%arg0: i32) -> (i32, i32) {
    %c0_i32 = arith.constant 0 : i32
    %c0_i32_0 = arith.constant 0 : i32
    return %c0_i32, %arg0 : i32, i32
  }
}

</mosaic_0001>

<bundles_post_ra>
// kernel: tpu_custom_call.1
= control target key start
LH: loop header
LB: loop body
LE: loop exit
PB: predicated region body
PF: predicated region fallthrough
CT: control target
= control target key end

     0   :  { %7 = vsyncpa [#allocation3], 0  ;;  %s170_s0 = inlined_call_operand.hbm [shape: f32[2,256], index: 0, kind: input, shape index: {}]   ;;  %s171_s1 = inlined_call_operand.hbm [shape: f32[2,256], index: 1, kind: input, shape index: {}]   ;;  %s172_s2 = inlined_call_operand.hbm [shape: f32[2,256], index: 2, kind: output, shape index: {}]  }
   0x1   :  { %8 = vsyncpa [#allocation6], 0 }
   0x2   :  { %9 = vsyncpa [#allocation4], 0  ;;  %s15_s11 = sshll.u32 %s170_s0, 4  ;;  %s143_s12 = smov [#allocation2]   ;;  %s16_s11 = int_to_ptr.hbm [resolvable:$true] %s15_s11 }
   0x3   :  { %s17_s13 = sshll.u32 %s143_s12, 4  ;;  %s26_s16 = sshll.u32 %s171_s1, 4  ;;  %s18_s13 = int_to_ptr.vmem [resolvable:$true] %s17_s13  ;;  %s27_s16 = int_to_ptr.hbm [resolvable:$true] %s26_s16 }
   0x4   :  { %20 = dma.hbm_to_vmem [thread:$0]  %s16_s11, 64, %s18_s13, [#allocation3]  }
   0x5   :  { %s144_s17 = smov [#allocation5]  }
   0x6   :  { %s28_s18 = sshll.u32 %s144_s17, 4  ;;  %s29_s18 = int_to_ptr.vmem [resolvable:$true] %s28_s18 }
   0x7   :  { %31 = dma.hbm_to_vmem [thread:$0]  %s27_s16, 64, %s29_s18, [#allocation6]  }
   0x8   :  { %137 = dma.done.wait [#allocation3], 64  }
   0x9   :  { %138 = vsyncadd [#allocation3], 4294967232 }
   0xa   :  { %139 = dma.done.wait [#allocation6], 64  }
   0xb   :  { %140 = vsyncadd [#allocation6], 4294967232  ;;  %s145_s19 = smov [#allocation7]   ;;  %s51_s22 = sshll.u32 %s172_s2, 4  ;;  %v40_v0 = vld [vmem:[#allocation2] sm:$0xf]  ;;  %s52_s22 = int_to_ptr.hbm [resolvable:$true] %s51_s22 }
   0xc   :  { %s49_s0 = sshll.u32 %s145_s19, 4  ;;  %v41_v1 = vld [vmem:[#allocation5] sm:$0xf]  ;;  %s50_s0 = int_to_ptr.vmem [resolvable:$true] %s49_s0 }
   0xd   :  { %v42_v2 = vadd.f32 %v41_v1, %v40_v0 }
   0xf   :  { %43 = vst [vmem:[#allocation7] sm:$0xf] %v42_v2 }
  0x10   :  { %54 = dma.vmem_to_hbm [thread:$0]  %s50_s0, 64, %s52_s22, [#allocation4]  }
  0x11   :  { %141 = dma.done.wait [#allocation4], 64  }
  0x12   :  { %142 = vsyncadd [#allocation4], 4294967232 }
  0x13   :  { %59 = vsyncpa [#allocation3], 1 }
  0x14   :  { %60 = vsyncpa [#allocation6], 1 }
  0x15   :  { %61 = vsyncpa [#allocation4], 1 }

</bundles_post_ra>
